<compile_context>
chip_gen: v7x
topology: tpu7x:2x2x1
jax: 0.10.0
libtpu: 0.0.40
codegen_flags: <defaults>
</compile_context>

<pallas_src>
from functools import partial

import jax
import jax.numpy as jnp
from jax.experimental import pallas as pl
from jax.experimental.pallas import tpu as pltpu


def _round_up(x, m):
    return (x + m - 1) // m * m


def _pick_tile(total, max_tile, multiple=128, min_tiles=1):
    """Largest divisor of `total` that is a multiple of `multiple`, <= max_tile,
    leaving at least `min_tiles` tiles when possible (falls back otherwise)."""
    best = multiple
    t = multiple
    while t <= min(max_tile, total):
        if total % t == 0 and total // t >= min_tiles:
            best = t
        t += multiple
    return best


def _vmem_budget_bytes():
    """~75% of per-core VMEM (headroom for double-buffering / compiler scratch).
    Fallback 48 MiB is safe on v5e/v6e (128 MiB) and v7x (64 MiB)."""
    try:
        cap = int(pltpu.get_tpu_info().vmem_capacity_bytes)
        if cap > 0:
            return (cap * 3) // 4
    except Exception:
        pass
    return 48 * 1024 * 1024


# ---------------------------------------------------------------------------
# Kernel 1: whole-network fused forward (small/medium graphs, one invocation)
#   adj / h / W streamed bf16, f32 accumulation, intermediates never leave
#   VMEM/vregs; adj is read from HBM exactly once for all layers.
# ---------------------------------------------------------------------------

def _fused_gnn_kernel(adj_ref, h_ref, w_ref, b_ref, o_ref, *, n_layers):
    adj = adj_ref[...]                               # (Np, Np) bf16
    h = h_ref[...]                                   # (Np, Dp) bf16
    x = None
    for li in range(n_layers):                       # static unroll
        xw = jnp.dot(h, w_ref[li], preferred_element_type=jnp.float32)
        x = jnp.dot(adj, xw.astype(jnp.bfloat16),
                    preferred_element_type=jnp.float32)
        x = x + b_ref[li]                            # f32 bias add
        if li < n_layers - 1:
            x = jnp.maximum(x, 0.0)
            h = x.astype(jnp.bfloat16)               # inter-layer h in bf16
    o_ref[...] = x.astype(o_ref.dtype)               # last layer kept f32


def gnn_forward_fused(adj, features, params):
    """Single pallas_call for the whole forward (everything fits VMEM)."""
    N = adj.shape[0]
    dims = [features.shape[1]] + [W.shape[1] for W, _ in params]
    L = len(params)
    Dp = _round_up(max(dims), 128)    # lane-dense feature width
    Np = _round_up(N, 128)            # lane-dense adj / aligned node rows

    adj_p = jnp.zeros((Np, Np), jnp.bfloat16).at[:N, :N].set(
        adj.astype(jnp.bfloat16))
    h_p = jnp.zeros((Np, Dp), jnp.bfloat16).at[:N, :dims[0]].set(
        features.astype(jnp.bfloat16))
    w_p = jnp.zeros((L, Dp, Dp), jnp.bfloat16)
    b_p = jnp.zeros((L, 1, Dp), jnp.float32)
    for li, (W, b) in enumerate(params):
        w_p = w_p.at[li, : W.shape[0], : W.shape[1]].set(W.astype(jnp.bfloat16))
        b_p = b_p.at[li, 0, : b.shape[0]].set(b)

    vmem_spec = pl.BlockSpec(memory_space=pltpu.MemorySpace.VMEM)
    out_p = pl.pallas_call(
        partial(_fused_gnn_kernel, n_layers=L),
        out_shape=jax.ShapeDtypeStruct((Np, Dp), jnp.float32),
        in_specs=[vmem_spec, vmem_spec, vmem_spec, vmem_spec],
        out_specs=vmem_spec,
        compiler_params=pltpu.CompilerParams(
            vmem_limit_bytes=_vmem_budget_bytes(),
        ),
    )(adj_p, h_p, w_p, b_p)

    return out_p[:N, : dims[-1]]


# ---------------------------------------------------------------------------
# Kernel 2: tiled per-layer path (large graphs)
#   Layer reassociated as  out = relu?( adj @ (h @ W) + b ):
#     (a) _hw_kernel:        xw = h_tile @ W              (node-tile parallel)
#     (b) _aggregate_kernel: out_tile = adj_tile @ xw     (K-tiled f32 acc)
# ---------------------------------------------------------------------------

def _hw_kernel(h_ref, w_ref, xw_ref):
    xw_ref[...] = jnp.dot(h_ref[...], w_ref[...],
                          preferred_element_type=jnp.float32
                          ).astype(xw_ref.dtype)


def _aggregate_kernel(adj_ref, xw_ref, b_ref, o_ref, acc_ref, *, apply_relu):
    k = pl.program_id(1)

    @pl.when(k == 0)
    def _():
        acc_ref[...] = jnp.zeros_like(acc_ref)

    acc_ref[...] += jnp.dot(adj_ref[...], xw_ref[...],
                            preferred_element_type=jnp.float32)

    @pl.when(k == pl.num_programs(1) - 1)
    def _():
        x = acc_ref[...] + b_ref[...]
        if apply_relu:
            x = jnp.maximum(x, 0.0)
        o_ref[...] = x.astype(o_ref.dtype)


def gnn_forward_tiled(adj, features, params, *, max_tile=512):
    """Per-layer fused kernels: node-tile (parallel) x K-tile (arbitrary)."""
    N = adj.shape[0]
    dims = [features.shape[1]] + [W.shape[1] for W, _ in params]
    dps = [_round_up(d, 128) for d in dims]
    Np = _round_up(N, 128)                 # pad only to 128, not to tile size
    budget = _vmem_budget_bytes()

    # >=2 node-row tiles when possible so both v7x TensorCores get work.
    tm = _pick_tile(Np, max_tile, 128, min_tiles=2)
    tk = _pick_tile(Np, max_tile, 128, min_tiles=1)

    adj_p = jnp.zeros((Np, Np), jnp.bfloat16).at[:N, :N].set(
        adj.astype(jnp.bfloat16))
    h = jnp.zeros((Np, dps[0]), jnp.bfloat16).at[:N, : dims[0]].set(
        features.astype(jnp.bfloat16))

    L = len(params)
    for li, (W, b) in enumerate(params):
        Fp, Hp = dps[li], dps[li + 1]
        w_p = jnp.zeros((Fp, Hp), jnp.bfloat16).at[
            : W.shape[0], : W.shape[1]].set(W.astype(jnp.bfloat16))
        b_p = jnp.zeros((1, Hp), jnp.float32).at[0, : b.shape[0]].set(b)
        last = li == L - 1

        # (a) xw = h @ W   (small matmul, W resident, node-row parallel)
        xw = pl.pallas_call(
            _hw_kernel,
            out_shape=jax.ShapeDtypeStruct((Np, Hp), jnp.bfloat16),
            grid=(Np // tm,),
            in_specs=[
                pl.BlockSpec((tm, Fp), lambda i: (i, 0)),
                pl.BlockSpec((Fp, Hp), lambda i: (0, 0)),
            ],
            out_specs=pl.BlockSpec((tm, Hp), lambda i: (i, 0)),
            compiler_params=pltpu.CompilerParams(
                dimension_semantics=("parallel",),
                vmem_limit_bytes=budget,
            ),
        )(h, w_p)

        # (b) out = relu?(adj @ xw + b)   (K-tiled f32 accumulator)
        out_dtype = jnp.float32 if last else jnp.bfloat16
        h = pl.pallas_call(
            partial(_aggregate_kernel, apply_relu=not last),
            out_shape=jax.ShapeDtypeStruct((Np, Hp), out_dtype),
            grid=(Np // tm, Np // tk),
            in_specs=[
                pl.BlockSpec((tm, tk), lambda i, k: (i, k)),   # adj tile
                pl.BlockSpec((tk, Hp), lambda i, k: (k, 0)),   # xw rows
                pl.BlockSpec((1, Hp), lambda i, k: (0, 0)),    # bias (resident)
            ],
            out_specs=pl.BlockSpec((tm, Hp), lambda i, k: (i, 0)),
            scratch_shapes=[pltpu.VMEM((tm, Hp), jnp.float32)],
            compiler_params=pltpu.CompilerParams(
                dimension_semantics=("parallel", "arbitrary"),
                vmem_limit_bytes=budget,
            ),
        )(adj_p, xw, b_p)

    return h[:N, : dims[-1]].astype(jnp.float32)


def gnn_forward(adj, features, params, *, fuse_threshold_bytes=24 * 1024 * 1024):
    """Dispatch: whole-network fusion when everything fits comfortably in VMEM
    (adj is then read from HBM once for all layers)."""
    N = adj.shape[0]
    dims = [features.shape[1]] + [W.shape[1] for W, _ in params]
    Dp = _round_up(max(dims), 128)
    Np = _round_up(N, 128)
    L = len(params)
    # bf16 adj/h/W, f32 bias/out; x2 for buffering / in-kernel temporaries.
    fused_bytes = 2 * (2 * Np * Np + 2 * Np * Dp + 2 * L * Dp * Dp
                       + 4 * L * Dp + 4 * Np * Dp)
    if fused_bytes <= fuse_threshold_bytes:
        return gnn_forward_fused(adj, features, params)
    return gnn_forward_tiled(adj, features, params)


# ---------------------------------------------------------------------------
# Parameter setup (plain JAX) + pure-JAX references
# ---------------------------------------------------------------------------

def xavier_uniform(key, shape):
    fan_in, fan_out = shape
    limit = (6.0 / (fan_in + fan_out)) ** 0.5
    return jax.random.uniform(key, shape, jnp.float32, -limit, limit)


def init_gnn_params(key, dim_feats, dim_h, n_classes, n_layers):
    """GNN(gnnlayer_type='gcn'): n_layers+1 GCN layers, xavier W, zero b."""
    dims = [dim_feats] + [dim_h] * n_layers + [n_classes]
    params = []
    for i in range(n_layers + 1):
        key, sub = jax.random.split(key)
        W = xavier_uniform(sub, (dims[i], dims[i + 1]))
        b = jnp.zeros((dims[i + 1],), jnp.float32)
        params.append((W, b))
    return params


def gnn_reference(adj, features, params, compute_dtype=jnp.float32):
    """Pure-JAX reference (matches the PyTorch forward, eval mode).

    compute_dtype=jnp.bfloat16 emulates the kernels' streaming precision
    (bf16 operands, f32 accumulation, f32 bias/ReLU, bf16 inter-layer h).
    """
    # TODO(synk): nn.Dropout is stochastic at train time; treated as identity.
    n = len(params)
    h = features.astype(compute_dtype)
    adj_c = adj.astype(compute_dtype)
    x = None
    for li, (W, b) in enumerate(params):
        xw = jnp.dot(h, W.astype(compute_dtype),
                     preferred_element_type=jnp.float32)
        x = jnp.dot(adj_c, xw.astype(compute_dtype),
                    preferred_element_type=jnp.float32) + b
        if li < n - 1:
            x = jnp.maximum(x, 0.0)
            h = x.astype(compute_dtype)
    return x


def make_adj(key, n):
    """Deterministic sparse-ish adjacency with self-loops, row-normalized."""
    raw = jax.random.uniform(key, (n, n), jnp.float32)
    a = (raw > 0.85).astype(jnp.float32)
    a = a + jnp.eye(n, dtype=jnp.float32)
    return a / jnp.sum(a, axis=1, keepdims=True)


# ---------------------------------------------------------------------------
# Main
# ---------------------------------------------------------------------------

if __name__ == "__main__":
    key = jax.random.PRNGKey(0)
    k_small, k_large = jax.random.split(key)

    # --- shipped small shapes: whole-network fused single pallas_call -------
    N1, F1, H1, C1, L1 = 64, 32, 32, 8, 2
    ka, kf, kp = jax.random.split(k_small, 3)
    adj1 = make_adj(ka, N1)
    feat1 = jax.random.normal(kf, (N1, F1), jnp.float32)
    params1 = init_gnn_params(kp, F1, H1, C1, L1)

    out1 = jax.block_until_ready(gnn_forward(adj1, feat1, params1))
    ref1_q = gnn_reference(adj1, feat1, params1, compute_dtype=jnp.bfloat16)
    ref1_f = gnn_reference(adj1, feat1, params1)
    assert out1.shape == (N1, C1), out1.shape
    assert jnp.allclose(out1, ref1_q, atol=1e-2, rtol=1e-2), "fused: bf16-ref mismatch"
    assert jnp.allclose(out1, ref1_f, atol=5e-2, rtol=5e-2), "fused: f32-ref mismatch"

    # --- larger graph: exercises the tiled per-layer kernels ----------------
    N2, F2, H2, C2, L2 = 384, 96, 64, 10, 2
    ka2, kf2, kp2 = jax.random.split(k_large, 3)
    adj2 = make_adj(ka2, N2)
    feat2 = jax.random.normal(kf2, (N2, F2), jnp.float32)
    params2 = init_gnn_params(kp2, F2, H2, C2, L2)

    out2 = jax.block_until_ready(gnn_forward_tiled(adj2, feat2, params2))
    ref2_q = gnn_reference(adj2, feat2, params2, compute_dtype=jnp.bfloat16)
    ref2_f = gnn_reference(adj2, feat2, params2)
    assert out2.shape == (N2, C2), out2.shape
    assert jnp.allclose(out2, ref2_q, atol=1e-2, rtol=1e-2), "tiled: bf16-ref mismatch"
    assert jnp.allclose(out2, ref2_f, atol=5e-2, rtol=5e-2), "tiled: f32-ref mismatch"

    print("KERNEL_OK")
</pallas_src>

<mosaic_0001>
module attributes {stable_mosaic.version = 11 : i64} {
  func.func @_fused_gnn_kernel(%arg0: memref<128x128xbf16, #tpu.memory_space<vmem>>, %arg1: memref<128x128xbf16, #tpu.memory_space<vmem>>, %arg2: memref<3x128x128xbf16, #tpu.memory_space<vmem>>, %arg3: memref<3x1x128xf32, #tpu.memory_space<vmem>>, %arg4: memref<128x128xf32, #tpu.memory_space<vmem>>) attributes {dimension_semantics = [], scalar_prefetch = 0 : i64, scratch_operands = 0 : i64, tpu.core_type = #tpu.core_type<tc>} {
    %c0 = arith.constant 0 : index
    %c0_0 = arith.constant 0 : index
    %0 = vector.load %arg0[%c0, %c0_0] : memref<128x128xbf16, #tpu.memory_space<vmem>>, vector<128x128xbf16>
    %c0_1 = arith.constant 0 : index
    %c0_2 = arith.constant 0 : index
    %1 = vector.load %arg1[%c0_1, %c0_2] : memref<128x128xbf16, #tpu.memory_space<vmem>>, vector<128x128xbf16>
    %c0_3 = arith.constant 0 : index
    %c0_4 = arith.constant 0 : index
    %c0_5 = arith.constant 0 : index
    %2 = vector.load %arg2[%c0_3, %c0_4, %c0_5] : memref<3x128x128xbf16, #tpu.memory_space<vmem>>, vector<1x128x128xbf16>
    %3 = vector.shape_cast %2 : vector<1x128x128xbf16> to vector<128x128xbf16>
    %cst = arith.constant dense<0.000000e+00> : vector<128x128xf32>
    %4 = tpu.matmul %1, %3, %cst {dimension_numbers = #tpu.dot_dimension_numbers<[1], [0], [0], [1], [0, 0, 1, 1], [], []>} : vector<128x128xbf16>, vector<128x128xbf16>, vector<128x128xf32> -> vector<128x128xf32>
    %5 = arith.truncf %4 : vector<128x128xf32> to vector<128x128xbf16>
    %cst_6 = arith.constant dense<0.000000e+00> : vector<128x128xf32>
    %6 = tpu.matmul %0, %5, %cst_6 {dimension_numbers = #tpu.dot_dimension_numbers<[1], [0], [0], [1], [0, 0, 1, 1], [], []>} : vector<128x128xbf16>, vector<128x128xbf16>, vector<128x128xf32> -> vector<128x128xf32>
    %c0_7 = arith.constant 0 : index
    %c0_8 = arith.constant 0 : index
    %c0_9 = arith.constant 0 : index
    %7 = vector.load %arg3[%c0_7, %c0_8, %c0_9] : memref<3x1x128xf32, #tpu.memory_space<vmem>>, vector<1x1x128xf32>
    %8 = vector.shape_cast %7 : vector<1x1x128xf32> to vector<1x128xf32>
    %9 = vector.broadcast %8 : vector<1x128xf32> to vector<128x128xf32>
    %10 = arith.addf %6, %9 : vector<128x128xf32>
    %cst_10 = arith.constant 0.000000e+00 : f32
    %11 = vector.broadcast %cst_10 : f32 to vector<128x128xf32>
    %12 = arith.maximumf %10, %11 : vector<128x128xf32>
    %13 = arith.truncf %12 : vector<128x128xf32> to vector<128x128xbf16>
    %c1 = arith.constant 1 : index
    %c0_11 = arith.constant 0 : index
    %c0_12 = arith.constant 0 : index
    %14 = vector.load %arg2[%c1, %c0_11, %c0_12] : memref<3x128x128xbf16, #tpu.memory_space<vmem>>, vector<1x128x128xbf16>
    %15 = vector.shape_cast %14 : vector<1x128x128xbf16> to vector<128x128xbf16>
    %cst_13 = arith.constant dense<0.000000e+00> : vector<128x128xf32>
    %16 = tpu.matmul %13, %15, %cst_13 {dimension_numbers = #tpu.dot_dimension_numbers<[1], [0], [0], [1], [0, 0, 1, 1], [], []>} : vector<128x128xbf16>, vector<128x128xbf16>, vector<128x128xf32> -> vector<128x128xf32>
    %17 = arith.truncf %16 : vector<128x128xf32> to vector<128x128xbf16>
    %cst_14 = arith.constant dense<0.000000e+00> : vector<128x128xf32>
    %18 = tpu.matmul %0, %17, %cst_14 {dimension_numbers = #tpu.dot_dimension_numbers<[1], [0], [0], [1], [0, 0, 1, 1], [], []>} : vector<128x128xbf16>, vector<128x128xbf16>, vector<128x128xf32> -> vector<128x128xf32>
    %c1_15 = arith.constant 1 : index
    %c0_16 = arith.constant 0 : index
    %c0_17 = arith.constant 0 : index
    %19 = vector.load %arg3[%c1_15, %c0_16, %c0_17] : memref<3x1x128xf32, #tpu.memory_space<vmem>>, vector<1x1x128xf32>
    %20 = vector.shape_cast %19 : vector<1x1x128xf32> to vector<1x128xf32>
    %21 = vector.broadcast %20 : vector<1x128xf32> to vector<128x128xf32>
    %22 = arith.addf %18, %21 : vector<128x128xf32>
    %cst_18 = arith.constant 0.000000e+00 : f32
    %23 = vector.broadcast %cst_18 : f32 to vector<128x128xf32>
    %24 = arith.maximumf %22, %23 : vector<128x128xf32>
    %25 = arith.truncf %24 : vector<128x128xf32> to vector<128x128xbf16>
    %c2 = arith.constant 2 : index
    %c0_19 = arith.constant 0 : index
    %c0_20 = arith.constant 0 : index
    %26 = vector.load %arg2[%c2, %c0_19, %c0_20] : memref<3x128x128xbf16, #tpu.memory_space<vmem>>, vector<1x128x128xbf16>
    %27 = vector.shape_cast %26 : vector<1x128x128xbf16> to vector<128x128xbf16>
    %cst_21 = arith.constant dense<0.000000e+00> : vector<128x128xf32>
    %28 = tpu.matmul %25, %27, %cst_21 {dimension_numbers = #tpu.dot_dimension_numbers<[1], [0], [0], [1], [0, 0, 1, 1], [], []>} : vector<128x128xbf16>, vector<128x128xbf16>, vector<128x128xf32> -> vector<128x128xf32>
    %29 = arith.truncf %28 : vector<128x128xf32> to vector<128x128xbf16>
    %cst_22 = arith.constant dense<0.000000e+00> : vector<128x128xf32>
    %30 = tpu.matmul %0, %29, %cst_22 {dimension_numbers = #tpu.dot_dimension_numbers<[1], [0], [0], [1], [0, 0, 1, 1], [], []>} : vector<128x128xbf16>, vector<128x128xbf16>, vector<128x128xf32> -> vector<128x128xf32>
    %c2_23 = arith.constant 2 : index
    %c0_24 = arith.constant 0 : index
    %c0_25 = arith.constant 0 : index
    %31 = vector.load %arg3[%c2_23, %c0_24, %c0_25] : memref<3x1x128xf32, #tpu.memory_space<vmem>>, vector<1x1x128xf32>
    %32 = vector.shape_cast %31 : vector<1x1x128xf32> to vector<1x128xf32>
    %33 = vector.broadcast %32 : vector<1x128xf32> to vector<128x128xf32>
    %34 = arith.addf %30, %33 : vector<128x128xf32>
    %c0_26 = arith.constant 0 : index
    %c0_27 = arith.constant 0 : index
    %35 = vector.load %arg4[%c0_26, %c0_27] : memref<128x128xf32, #tpu.memory_space<vmem>>, vector<128x128xf32>
    tpu.vector_store %arg4[%c0_26, %c0_27], %34 {strides = array<i32>} : memref<128x128xf32, #tpu.memory_space<vmem>>, vector<128x128xf32>,
    return
  }
}

</mosaic_0001>

<bundles_post_ra>
// kernel: tpu_custom_call.1
= control target key start
LH: loop header
LB: loop body
LE: loop exit
PB: predicated region body
PF: predicated region fallthrough
CT: control target
= control target key end

     0   :  { %9 = vsyncpa [#allocation3], 0  ;;  %s1714_s0 = inlined_call_operand.hbm [shape: bf16[128,128], index: 0, kind: input, shape index: {}]   ;;  %s1715_s1 = inlined_call_operand.hbm [shape: bf16[128,128], index: 1, kind: input, shape index: {}]   ;;  %s1716_s2 = inlined_call_operand.hbm [shape: bf16[3,128,128], index: 2, kind: input, shape index: {}]   ;;  %s1717_s3 = inlined_call_operand.vmem [shape: f32[3,1,128], index: 3, kind: input, shape index: {}]   ;;  %s1718_s4 = inlined_call_operand.hbm [shape: f32[128,128], index: 4, kind: output, shape index: {}]  }
   0x1   :  { %10 = vsyncpa [#allocation6], 0 }
   0x2   :  { %11 = vsyncpa [#allocation4], 0  ;;  %s1568_s15 = smov [#allocation5]   ;;  %s1569_s17 = smov [#allocation2]  }
   0x3   :  { %s29_s16 = sshll.u32 %s1568_s15, 4  ;;  %s17_s18 = sshll.u32 %s1569_s17, 4  ;;  %s30_s16 = int_to_ptr.vmem [resolvable:$true] %s29_s16  ;;  %s1601_s18 = int_to_ptr.vmem [resolvable:$true] %s17_s18 }
   0x4   :  { %s1474_s21 = scalar_lea.hbm %s1715_s1, 1024 }
   0x5   :  { %p1475_p0 = scmp.ne.s32.totalorder %s1715_s1, %s1474_s21  ;;  %p1478_p1 = scmp.lt.u32.totalorder %s1474_s21, %s1715_s1 }
   0x7   :  { %p1480_p2 = pnand %p1478_p1, %p1475_p0 }
   0x9   :  { %1483 = shalt.err (!%p1480_p2)
}
   0xa   :  { %s1484_s26 = scalar_lea.vmem %s30_s16, 1024  ;;  %p1489_p4 = scmp.lt.s32.totalorder %s30_s16, %s30_s16 }
   0xb   :  { %p1485_p3 = scmp.ne.s32.totalorder %s30_s16, %s1484_s26  ;;  %p1490_p5 = scmp.lt.s32.totalorder %s1484_s26, %s1484_s26 }
   0xd   :  { %p1491_p6 = por %p1490_p5, %p1489_p4 }
   0xf   :  { %p1492_p7 = pnand %p1491_p6, %p1485_p3 }
  0x11   :  { %1495 = shalt.err (!%p1492_p7)
}
  0x12   :  { %s1570_s27 = smov 64   ;;  %s1571_s28 = smov 4  }
  0x13   :  { %35 = dma.hbm_to_vmem [thread:$0]  %s1715_s1, 1024, %s30_s16, [#allocation6], %s1570_s27, %s1570_s27, %s1571_s28  }
  0x14   :  { %s1496_s7 = scalar_lea.hbm %s1714_s0, 1024 }
  0x15   :  { %p1497_p8 = scmp.ne.s32.totalorder %s1714_s0, %s1496_s7  ;;  %p1500_p9 = scmp.lt.u32.totalorder %s1496_s7, %s1714_s0 }
  0x17   :  { %p1502_p10 = pnand %p1500_p9, %p1497_p8 }
  0x19   :  { %1505 = shalt.err (!%p1502_p10)
}
  0x1a   :  { %s1506_s12 = scalar_lea.vmem %s1601_s18, 1024  ;;  %p1511_p12 = scmp.lt.s32.totalorder %s1601_s18, %s1601_s18 }
  0x1b   :  { %p1507_p11 = scmp.ne.s32.totalorder %s1601_s18, %s1506_s12  ;;  %p1512_p13 = scmp.lt.s32.totalorder %s1506_s12, %s1506_s12 }
  0x1d   :  { %p1513_p0 = por %p1512_p13, %p1511_p12 }
  0x1f   :  { %p1514_p1 = pnand %p1513_p0, %p1507_p11 }
  0x21   :  { %1517 = shalt.err (!%p1514_p1)
}
  0x22   :  { %23 = dma.hbm_to_vmem [thread:$0]  %s1714_s0, 1024, %s1601_s18, [#allocation3], %s1570_s27, %s1570_s27, %s1571_s28  }
  0x23   :  { %s1572_s14 = smov [#allocation7]   ;;  %s1518_s19 = scalar_lea.hbm %s1716_s2, 3072 }
  0x24   :  { %s41_s15 = sshll.u32 %s1572_s14, 4  ;;  %p1519_p2 = scmp.ne.s32.totalorder %s1716_s2, %s1518_s19  ;;  %s42_s15 = int_to_ptr.vmem [resolvable:$true] %s41_s15 }
  0x25   :  { %p1522_p3 = scmp.lt.u32.totalorder %s1518_s19, %s1716_s2 }
  0x27   :  { %p1524_p4 = pnand %p1522_p3, %p1519_p2 }
  0x29   :  { %1527 = shalt.err (!%p1524_p4)
}
  0x2a   :  { %s1528_s24 = scalar_lea.vmem %s42_s15, 3072  ;;  %p1533_p6 = scmp.lt.s32.totalorder %s42_s15, %s42_s15 }
  0x2b   :  { %p1529_p5 = scmp.ne.s32.totalorder %s42_s15, %s1528_s24  ;;  %p1534_p7 = scmp.lt.s32.totalorder %s1528_s24, %s1528_s24 }
  0x2d   :  { %p1535_p8 = por %p1534_p7, %p1533_p6 }
  0x2f   :  { %p1536_p9 = pnand %p1535_p8, %p1529_p5 }
  0x31   :  { %1539 = shalt.err (!%p1536_p9)
}
  0x32   :  { %47 = dma.hbm_to_vmem [thread:$0]  %s1716_s2, 3072, %s42_s15, [#allocation6], %s1570_s27, %s1570_s27, %s1571_s28  }
  0x33   :  { %1562 = dma.done.wait [#allocation3], 1024  }
  0x34   :  { %1563 = vsyncadd [#allocation3], 4294966272 }
  0x35   :  { %1564 = dma.done.wait [#allocation6], 4096  }
  0x36   :  { %1565 = vsyncadd [#allocation6], 4294963200  ;;  %v1434_v0 = vld [vmem:[#allocation7] sm:$0xff]   ;;  %v1435_v1 = vld [vmem:[#allocation7 + $0x8] sm:$0xff]  }
  0x37   :  { %1234 = vmatprep.subr.bf16.mxu0 %v1434_v0  ;;  %v1436_v2 = vld [vmem:[#allocation7 + $0x10] sm:$0xff]   ;;  %v1437_v3 = vld [vmem:[#allocation7 + $0x18] sm:$0xff]   ;;  %v1442_v4 = vld [vmem:[#allocation5] sm:$0xff]  }
  0x38   :  { %1235 = vmatpush3.bf16.msra.mxu0 %v1434_v0  ;;  %1250 = vmatprep.mubr.bf16.mxu0 %v1442_v4  ;;  %v1438_v5 = vld [vmem:[#allocation7 + $0x20] sm:$0xff]   ;;  %v1439_v6 = vld [vmem:[#allocation7 + $0x28] sm:$0xff]   ;;  %v1440_v7 = vld [vmem:[#allocation7 + $0x30] sm:$0xff]  }
  0x39   :  { %1236 = vmatprep.subr.bf16.mxu0 %v1435_v1  ;;  %v1441_v8 = vld [vmem:[#allocation7 + $0x38] sm:$0xff]   ;;  %v1443_v9 = vld [vmem:[#allocation5 + $0x8] sm:$0xff]   ;;  %v1444_v10 = vld [vmem:[#allocation5 + $0x10] sm:$0xff]  }
  0x3a   :  { %v1445_v11 = vld [vmem:[#allocation5 + $0x18] sm:$0xff]   ;;  %v1446_v12 = vld [vmem:[#allocation5 + $0x20] sm:$0xff]   ;;  %v1447_v13 = vld [vmem:[#allocation5 + $0x28] sm:$0xff]  }
  0x3b   :  { %v1448_v14 = vld [vmem:[#allocation5 + $0x30] sm:$0xff]   ;;  %v1449_v15 = vld [vmem:[#allocation5 + $0x38] sm:$0xff]   ;;  %v1653_v16 = vld [vmem:[#allocation2] sm:$0xff]  }
  0x3c   :  { %1237 = vmatpush3.bf16.msra.mxu0 %v1435_v1  ;;  %1282 = vmatprep.mubr.bf16.mxu1 %v1653_v16  ;;  %v1458_v17 = vld [vmem:[#allocation7 + $0x40] sm:$0xff]   ;;  %v1459_v18 = vld [vmem:[#allocation7 + $0x48] sm:$0xff]   ;;  %v1460_v19 = vld [vmem:[#allocation7 + $0x50] sm:$0xff]  }
  0x3d   :  { %1238 = vmatprep.subr.bf16.mxu0 %v1436_v2  ;;  %v1461_v20 = vld [vmem:[#allocation7 + $0x58] sm:$0xff]   ;;  %v1462_v21 = vld [vmem:[#allocation7 + $0x60] sm:$0xff]   ;;  %v1463_v22 = vld [vmem:[#allocation7 + $0x68] sm:$0xff]  }
  0x3e   :  { %v1656_v47 = vld [vmem:[#allocation2 + $0x8] sm:$0xff]   ;;  %v1658_v48 = vld [vmem:[#allocation2 + $0x10] sm:$0xff]   ;;  %v1662_v49 = vld [vmem:[#allocation2 + $0x18] sm:$0xff]  }
  0x3f   :  { %v1664_v50 = vld [vmem:[#allocation2 + $0x20] sm:$0xff]   ;;  %v1668_v51 = vld [vmem:[#allocation2 + $0x28] sm:$0xff]   ;;  %v1670_v52 = vld [vmem:[#allocation2 + $0x30] sm:$0xff]  }
  0x40   :  { %1239 = vmatpush3.bf16.msra.mxu0 %v1436_v2  ;;  %v1674_v53 = vld [vmem:[#allocation2 + $0x38] sm:$0xff]   ;;  %v1464_v54 = vld [vmem:[#allocation7 + $0x70] sm:$0xff]   ;;  %v1109_v56 = vld [vmem:[%s1717_s3] ss:$0 sm:$0xff] }
  0x41   :  { %1240 = vmatprep.subr.bf16.mxu0 %v1437_v3  ;;  %v1465_v55 = vld [vmem:[#allocation7 + $0x78] sm:$0xff]  }
  0x44   :  { %1241 = vmatpush3.bf16.msra.mxu0 %v1437_v3 }
  0x45   :  { %1242 = vmatprep.subr.bf16.mxu0 %v1438_v5 }
  0x48   :  { %1243 = vmatpush3.bf16.msra.mxu0 %v1438_v5 }
  0x49   :  { %1244 = vmatprep.subr.bf16.mxu0 %v1439_v6 }
  0x4c   :  { %1245 = vmatpush3.bf16.msra.mxu0 %v1439_v6 }
  0x4d   :  { %1246 = vmatprep.subr.bf16.mxu0 %v1440_v7 }
  0x50   :  { %1247 = vmatpush3.bf16.msra.mxu0 %v1440_v7 }
  0x51   :  { %1248 = vmatprep.subr.bf16.mxu0 %v1441_v8 }
  0x54   :  { %1249 = vmatpush3.bf16.msra.mxu0 %v1441_v8 }
  0x55   :  { %1298 = vmatprep.subr.bf16.mxu0 %v1458_v17 }
  0x57   :  { %1251 = vmatmul.mubr.bf16.vlgmr.msra.gmra.mrb[0].mxu0 %v1443_v9 }
  0x58   :  { %1254 = vmatprep.mubr.bf16.mxu0 %v1444_v10  ;;  %1299 = vmatpush3.bf16.msra.mxu0 %v1458_v17 }
  0x59   :  { %1300 = vmatprep.subr.bf16.mxu0 %v1459_v18 }
  0x5c   :  { %1301 = vmatpush3.bf16.msra.mxu0 %v1459_v18 }
  0x5d   :  { %1302 = vmatprep.subr.bf16.mxu0 %v1460_v19 }
  0x5f   :  { %1255 = vmatmul.mubr.bf16.gmra.mrb[4].mxu0 %v1445_v11 }
  0x60   :  { %1258 = vmatprep.mubr.bf16.mxu0 %v1446_v12  ;;  %1303 = vmatpush3.bf16.msra.mxu0 %v1460_v19 }
  0x61   :  { %1304 = vmatprep.subr.bf16.mxu0 %v1461_v20 }
  0x64   :  { %1305 = vmatpush3.bf16.msra.mxu0 %v1461_v20 }
  0x65   :  { %1306 = vmatprep.subr.bf16.mxu0 %v1462_v21 }
  0x67   :  { %1259 = vmatmul.mubr.bf16.gmra.mrb[8].mxu0 %v1447_v13 }
  0x68   :  { %1262 = vmatprep.mubr.bf16.mxu0 %v1448_v14  ;;  %1307 = vmatpush3.bf16.msra.mxu0 %v1462_v21 }
  0x69   :  { %1308 = vmatprep.subr.bf16.mxu0 %v1463_v22 }
  0x6c   :  { %1309 = vmatpush3.bf16.msra.mxu0 %v1463_v22 }
  0x6d   :  { %1310 = vmatprep.subr.bf16.mxu0 %v1464_v54 }
  0x6f   :  { %1263 = vmatmul.mubr.bf16.gmra.mrb[12].mxu0 %v1449_v15 }
  0x70   :  { %1311 = vmatpush3.bf16.msra.mxu0 %v1464_v54 }
  0x71   :  { %1312 = vmatprep.subr.bf16.mxu0 %v1465_v55 }
  0x74   :  { %1313 = vmatpush3.bf16.msra.mxu0 %v1465_v55 }
 0x12a   :  { %v1252_v23 = vpop.f32.mrb[0].mxu0 }
 0x12b   :  { %v238_v24 = vpop.f32.mrb[1].mxu0 }
 0x12c   :  { %v1253_v25 = vpop.f32.mrb[2].mxu0 }
 0x12d   :  { %v302_v26 = vpack.c.bf16 %v1253_v25, %v1252_v23  ;;  %v241_v27 = vpop.f32.mrb[3].mxu0 }
 0x12e   :  { %v301_v28 = vpack.c.bf16 %v241_v27, %v238_v24 }
 0x130   :  { %1266 = vmatprep.subr.bf16.mxu1 %v301_v28 }
 0x131   :  { %1267 = vmatpush3.bf16.msra.mxu1 %v301_v28 }
 0x132   :  { %v1256_v29 = vpop.f32.mrb[4].mxu0  ;;  %1268 = vmatprep.subr.bf16.mxu1 %v302_v26 }
 0x133   :  { %v254_v30 = vpop.f32.mrb[5].mxu0 }
 0x134   :  { %v1257_v31 = vpop.f32.mrb[6].mxu0 }
 0x135   :  { %v304_v32 = vpack.c.bf16 %v1257_v31, %v1256_v29  ;;  %v257_v33 = vpop.f32.mrb[7].mxu0  ;;  %1269 = vmatpush3.bf16.msra.mxu1 %v302_v26 }
 0x136   :  { %v303_v34 = vpack.c.bf16 %v257_v33, %v254_v30 }
 0x138   :  { %1270 = vmatprep.subr.bf16.mxu1 %v303_v34 }
 0x139   :  { %1271 = vmatpush3.bf16.msra.mxu1 %v303_v34 }
 0x13a   :  { %v1260_v35 = vpop.f32.mrb[8].mxu0  ;;  %1272 = vmatprep.subr.bf16.mxu1 %v304_v32 }
 0x13b   :  { %v270_v36 = vpop.f32.mrb[9].mxu0 }
 0x13c   :  { %v1261_v37 = vpop.f32.mrb[10].mxu0 }
 0x13d   :  { %v306_v38 = vpack.c.bf16 %v1261_v37, %v1260_v35  ;;  %v273_v39 = vpop.f32.mrb[11].mxu0  ;;  %1273 = vmatpush3.bf16.msra.mxu1 %v304_v32 }
 0x13e   :  { %v305_v40 = vpack.c.bf16 %v273_v39, %v270_v36 }
 0x140   :  { %1274 = vmatprep.subr.bf16.mxu1 %v305_v40 }
 0x141   :  { %1275 = vmatpush3.bf16.msra.mxu1 %v305_v40 }
 0x142   :  { %v1264_v41 = vpop.f32.mrb[12].mxu0  ;;  %1276 = vmatprep.subr.bf16.mxu1 %v306_v38 }
 0x143   :  { %v286_v42 = vpop.f32.mrb[13].mxu0 }
 0x144   :  { %v1265_v43 = vpop.f32.mrb[14].mxu0 }
 0x145   :  { %v308_v44 = vpack.c.bf16 %v1265_v43, %v1264_v41  ;;  %v289_v45 = vpop.f32.mrb[15].mxu0  ;;  %1277 = vmatpush3.bf16.msra.mxu1 %v306_v38 }
 0x146   :  { %v307_v46 = vpack.c.bf16 %v289_v45, %v286_v42 }
 0x148   :  { %1278 = vmatprep.subr.bf16.mxu1 %v307_v46 }
 0x149   :  { %1279 = vmatpush3.bf16.msra.mxu1 %v307_v46 }
 0x14a   :  { %1280 = vmatprep.subr.bf16.mxu1 %v308_v44 }
 0x14d   :  { %1281 = vmatpush3.bf16.msra.mxu1 %v308_v44 }
 0x150   :  { %1283 = vmatmul.mubr.bf16.vlgmr.msra.gmra.mrb[0].mxu1 %v1656_v47 }
 0x151   :  { %1286 = vmatprep.mubr.bf16.mxu1 %v1658_v48 }
 0x158   :  { %1287 = vmatmul.mubr.bf16.gmra.mrb[4].mxu1 %v1662_v49 }
 0x159   :  { %1290 = vmatprep.mubr.bf16.mxu1 %v1664_v50 }
 0x160   :  { %1291 = vmatmul.mubr.bf16.gmra.mrb[8].mxu1 %v1668_v51 }
 0x161   :  { %1294 = vmatprep.mubr.bf16.mxu1 %v1670_v52 }
 0x168   :  { %1295 = vmatmul.mubr.bf16.gmra.mrb[12].mxu1 %v1674_v53 }
 0x169   :  { %1346 = vmatprep.mubr.bf16.mxu1 %v1653_v16 }
 0x223   :  { %v1284_v57 = vpop.f32.mrb[0].mxu1 }
 0x224   :  { %v407_v58 = vadd.f32 %v1284_v57, %v1109_v56  ;;  %v398_v59 = vpop.f32.mrb[1].mxu1 }
 0x225   :  { %v399_v60 = vadd.f32 %v1109_v56, %v398_v59  ;;  %v1285_v61 = vpop.f32.mrb[2].mxu1  ;;  %v1467_v59 = vld [vmem:[#allocation7 + $0x88] sm:$0xff]  }
 0x226   :  { %v410_v62 = vadd.f32 %v1285_v61, %v1109_v56  ;;  %v401_v63 = vpop.f32.mrb[3].mxu1  ;;  %v463_v1 = vmax.f32 %v407_v58, 0.0  ;;  %v1466_v58 = vld [vmem:[#allocation7 + $0x80] sm:$0xff]   ;;  %v1469_v61 = vld [vmem:[#allocation7 + $0x98] sm:$0xff]  }
 0x227   :  { %v402_v0 = vadd.f32 %v1109_v56, %v401_v63  ;;  %v461_v3 = vmax.f32 %v399_v60, 0.0  ;;  %1362 = vmatprep.subr.bf16.mxu0 %v1466_v58  ;;  %v1468_v60 = vld [vmem:[#allocation7 + $0x90] sm:$0xff]  }
 0x228   :  { %v464_v2 = vmax.f32 %v410_v62, 0.0  ;;  %v1471_v62 = vld [vmem:[#allocation7 + $0xa8] sm:$0xff]  }
 0x229   :  { %v462_v4 = vmax.f32 %v402_v0, 0.0 }
 0x22a   :  { %v478_v5 = vpack.c.bf16 %v464_v2, %v463_v1 }
 0x22b   :  { %v477_v6 = vpack.c.bf16 %v462_v4, %v461_v3  ;;  %v1288_v7 = vpop.f32.mrb[4].mxu1 }
 0x22c   :  { %v423_v8 = vadd.f32 %v1288_v7, %v1109_v56  ;;  %v414_v9 = vpop.f32.mrb[5].mxu1 }
 0x22d   :  { %v415_v10 = vadd.f32 %v1109_v56, %v414_v9  ;;  %v1289_v11 = vpop.f32.mrb[6].mxu1  ;;  %1314 = vmatprep.mubr.bf16.mxu0 %v477_v6 }
 0x22e   :  { %v426_v12 = vadd.f32 %v1289_v11, %v1109_v56  ;;  %v417_v13 = vpop.f32.mrb[7].mxu1  ;;  %1315 = vmatmul.mubr.bf16.vlgmr.msra.gmra.mrb[16].mxu0 %v478_v5  ;;  %v467_v15 = vmax.f32 %v423_v8, 0.0 }
 0x22f   :  { %v418_v14 = vadd.f32 %v1109_v56, %v417_v13  ;;  %v465_v18 = vmax.f32 %v415_v10, 0.0  ;;  %1363 = vmatpush3.bf16.msra.mxu0 %v1466_v58 }
 0x230   :  { %v468_v17 = vmax.f32 %v426_v12, 0.0  ;;  %1364 = vmatprep.subr.bf16.mxu0 %v1467_v59 }
 0x231   :  { %v466_v19 = vmax.f32 %v418_v14, 0.0 }
 0x232   :  { %v480_v20 = vpack.c.bf16 %v468_v17, %v467_v15 }
 0x233   :  { %v479_v21 = vpack.c.bf16 %v466_v19, %v465_v18  ;;  %v1292_v22 = vpop.f32.mrb[8].mxu1  ;;  %1365 = vmatpush3.bf16.msra.mxu0 %v1467_v59 }
 0x234   :  { %v439_v23 = vadd.f32 %v1292_v22, %v1109_v56  ;;  %v430_v24 = vpop.f32.mrb[9].mxu1  ;;  %1366 = vmatprep.subr.bf16.mxu0 %v1468_v60 }
 0x235   :  { %v431_v25 = vadd.f32 %v1109_v56, %v430_v24  ;;  %v1293_v26 = vpop.f32.mrb[10].mxu1  ;;  %1318 = vmatprep.mubr.bf16.mxu0 %v479_v21  ;;  %v1472_v24 = vld [vmem:[#allocation7 + $0xb0] sm:$0xff]  }
 0x236   :  { %v442_v27 = vadd.f32 %v1293_v26, %v1109_v56  ;;  %v433_v28 = vpop.f32.mrb[11].mxu1  ;;  %1319 = vmatmul.mubr.bf16.gmra.mrb[20].mxu0 %v480_v20  ;;  %v471_v30 = vmax.f32 %v439_v23, 0.0  ;;  %v1127_v26 = vld [vmem:[%s1717_s3 + $0x1] ss:$0 sm:$0xff] }
 0x237   :  { %v434_v29 = vadd.f32 %v1109_v56, %v433_v28  ;;  %v469_v32 = vmax.f32 %v431_v25, 0.0  ;;  %1367 = vmatpush3.bf16.msra.mxu0 %v1468_v60  ;;  %v1473_v25 = vld [vmem:[#allocation7 + $0xb8] sm:$0xff]  }
 0x238   :  { %v472_v31 = vmax.f32 %v442_v27, 0.0  ;;  %1368 = vmatprep.subr.bf16.mxu0 %v1469_v61 }
 0x239   :  { %v470_v33 = vmax.f32 %v434_v29, 0.0 }
 0x23a   :  { %v482_v34 = vpack.c.bf16 %v472_v31, %v471_v30 }
 0x23b   :  { %v481_v35 = vpack.c.bf16 %v470_v33, %v469_v32  ;;  %v1296_v36 = vpop.f32.mrb[12].mxu1  ;;  %1369 = vmatpush3.bf16.msra.mxu0 %v1469_v61 }
 0x23c   :  { %v455_v37 = vadd.f32 %v1296_v36, %v1109_v56  ;;  %v446_v38 = vpop.f32.mrb[13].mxu1 }
 0x23d   :  { %v447_v39 = vadd.f32 %v1109_v56, %v446_v38  ;;  %v1297_v40 = vpop.f32.mrb[14].mxu1  ;;  %1322 = vmatprep.mubr.bf16.mxu0 %v481_v35 }
 0x23e   :  { %v458_v41 = vadd.f32 %v1297_v40, %v1109_v56  ;;  %v449_v42 = vpop.f32.mrb[15].mxu1  ;;  %1323 = vmatmul.mubr.bf16.gmra.mrb[24].mxu0 %v482_v34  ;;  %v475_v44 = vmax.f32 %v455_v37, 0.0 }
 0x23f   :  { %v450_v43 = vadd.f32 %v1109_v56, %v449_v42  ;;  %v473_v46 = vmax.f32 %v447_v39, 0.0  ;;  %v1470_v56 = vld [vmem:[#allocation7 + $0xa0] sm:$0xff]  }
 0x240   :  { %v476_v45 = vmax.f32 %v458_v41, 0.0  ;;  %1370 = vmatprep.subr.bf16.mxu0 %v1470_v56 }
 0x241   :  { %v474_v54 = vmax.f32 %v450_v43, 0.0  ;;  %1371 = vmatpush3.bf16.msra.mxu0 %v1470_v56 }
 0x242   :  { %v484_v55 = vpack.c.bf16 %v476_v45, %v475_v44  ;;  %1372 = vmatprep.subr.bf16.mxu0 %v1471_v62 }
 0x243   :  { %v483_v57 = vpack.c.bf16 %v474_v54, %v473_v46 }
 0x245   :  { %1326 = vmatprep.mubr.bf16.mxu0 %v483_v57  ;;  %1373 = vmatpush3.bf16.msra.mxu0 %v1471_v62 }
 0x246   :  { %1327 = vmatmul.mubr.bf16.gmra.mrb[28].mxu0 %v484_v55  ;;  %1374 = vmatprep.subr.bf16.mxu0 %v1472_v24 }
 0x249   :  { %1375 = vmatpush3.bf16.msra.mxu0 %v1472_v24 }
 0x24a   :  { %1376 = vmatprep.subr.bf16.mxu0 %v1473_v25 }
 0x24d   :  { %1377 = vmatpush3.bf16.msra.mxu0 %v1473_v25 }
 0x301   :  { %v1316_v63 = vpop.f32.mrb[16].mxu0 }
 0x302   :  { %v584_v0 = vpop.f32.mrb[17].mxu0 }
 0x303   :  { %v1317_v1 = vpop.f32.mrb[18].mxu0 }
 0x304   :  { %v648_v2 = vpack.c.bf16 %v1317_v1, %v1316_v63  ;;  %v587_v3 = vpop.f32.mrb[19].mxu0 }
 0x305   :  { %v647_v4 = vpack.c.bf16 %v587_v3, %v584_v0 }
 0x307   :  { %1330 = vmatprep.subr.bf16.mxu1 %v647_v4 }
 0x308   :  { %1331 = vmatpush3.bf16.msra.mxu1 %v647_v4 }
 0x309   :  { %v1320_v5 = vpop.f32.mrb[20].mxu0  ;;  %1332 = vmatprep.subr.bf16.mxu1 %v648_v2 }
 0x30a   :  { %v600_v6 = vpop.f32.mrb[21].mxu0 }
 0x30b   :  { %v1321_v7 = vpop.f32.mrb[22].mxu0 }
 0x30c   :  { %v650_v8 = vpack.c.bf16 %v1321_v7, %v1320_v5  ;;  %v603_v9 = vpop.f32.mrb[23].mxu0  ;;  %1333 = vmatpush3.bf16.msra.mxu1 %v648_v2 }
 0x30d   :  { %v649_v10 = vpack.c.bf16 %v603_v9, %v600_v6 }
 0x30f   :  { %1334 = vmatprep.subr.bf16.mxu1 %v649_v10 }
 0x310   :  { %1335 = vmatpush3.bf16.msra.mxu1 %v649_v10 }
 0x311   :  { %v1324_v11 = vpop.f32.mrb[24].mxu0  ;;  %1336 = vmatprep.subr.bf16.mxu1 %v650_v8 }
 0x312   :  { %v616_v12 = vpop.f32.mrb[25].mxu0 }
 0x313   :  { %v1325_v13 = vpop.f32.mrb[26].mxu0 }
 0x314   :  { %v652_v14 = vpack.c.bf16 %v1325_v13, %v1324_v11  ;;  %v619_v15 = vpop.f32.mrb[27].mxu0  ;;  %1337 = vmatpush3.bf16.msra.mxu1 %v650_v8 }
 0x315   :  { %v651_v17 = vpack.c.bf16 %v619_v15, %v616_v12 }
 0x317   :  { %1338 = vmatprep.subr.bf16.mxu1 %v651_v17 }
 0x318   :  { %1339 = vmatpush3.bf16.msra.mxu1 %v651_v17 }
 0x319   :  { %v1328_v18 = vpop.f32.mrb[28].mxu0  ;;  %1340 = vmatprep.subr.bf16.mxu1 %v652_v14 }
 0x31a   :  { %v632_v19 = vpop.f32.mrb[29].mxu0 }
 0x31b   :  { %v1329_v20 = vpop.f32.mrb[30].mxu0 }
 0x31c   :  { %v654_v21 = vpack.c.bf16 %v1329_v20, %v1328_v18  ;;  %v635_v22 = vpop.f32.mrb[31].mxu0  ;;  %1341 = vmatpush3.bf16.msra.mxu1 %v652_v14 }
 0x31d   :  { %v653_v23 = vpack.c.bf16 %v635_v22, %v632_v19 }
 0x31f   :  { %1342 = vmatprep.subr.bf16.mxu1 %v653_v23 }
 0x320   :  { %1343 = vmatpush3.bf16.msra.mxu1 %v653_v23 }
 0x321   :  { %1344 = vmatprep.subr.bf16.mxu1 %v654_v21 }
 0x324   :  { %1345 = vmatpush3.bf16.msra.mxu1 %v654_v21 }
 0x327   :  { %1347 = vmatmul.mubr.bf16.vlgmr.msra.gmra.mrb[16].mxu1 %v1656_v47 }
 0x328   :  { %1350 = vmatprep.mubr.bf16.mxu1 %v1658_v48 }
 0x32f   :  { %1351 = vmatmul.mubr.bf16.gmra.mrb[20].mxu1 %v1662_v49 }
 0x330   :  { %1354 = vmatprep.mubr.bf16.mxu1 %v1664_v50 }
 0x337   :  { %1355 = vmatmul.mubr.bf16.gmra.mrb[24].mxu1 %v1668_v51 }
 0x338   :  { %1358 = vmatprep.mubr.bf16.mxu1 %v1670_v52 }
 0x33f   :  { %1359 = vmatmul.mubr.bf16.gmra.mrb[28].mxu1 %v1674_v53 }
 0x340   :  { %1410 = vmatprep.mubr.bf16.mxu1 %v1653_v16 }
 0x3fa   :  { %v1348_v27 = vpop.f32.mrb[16].mxu1 }
 0x3fb   :  { %v706_v28 = vadd.f32 %v1348_v27, %v1127_v26  ;;  %v697_v29 = vpop.f32.mrb[17].mxu1 }
 0x3fc   :  { %v698_v30 = vadd.f32 %v1127_v26, %v697_v29  ;;  %v1349_v31 = vpop.f32.mrb[18].mxu1 }
 0x3fd   :  { %v709_v32 = vadd.f32 %v1349_v31, %v1127_v26  ;;  %v700_v33 = vpop.f32.mrb[19].mxu1  ;;  %v762_v35 = vmax.f32 %v706_v28, 0.0 }
 0x3fe   :  { %v701_v34 = vadd.f32 %v1127_v26, %v700_v33  ;;  %v760_v36 = vmax.f32 %v698_v30, 0.0 }
 0x3ff   :  { %v763_v16 = vmax.f32 %v709_v32, 0.0 }
 0x400   :  { %v761_v37 = vmax.f32 %v701_v34, 0.0 }
 0x401   :  { %v777_v38 = vpack.c.bf16 %v763_v16, %v762_v35 }
 0x402   :  { %v776_v39 = vpack.c.bf16 %v761_v37, %v760_v36  ;;  %v1352_v40 = vpop.f32.mrb[20].mxu1 }
 0x403   :  { %v722_v41 = vadd.f32 %v1352_v40, %v1127_v26  ;;  %v713_v42 = vpop.f32.mrb[21].mxu1 }
 0x404   :  { %v714_v43 = vadd.f32 %v1127_v26, %v713_v42  ;;  %v1353_v44 = vpop.f32.mrb[22].mxu1  ;;  %1378 = vmatprep.mubr.bf16.mxu0 %v776_v39 }
 0x405   :  { %v725_v45 = vadd.f32 %v1353_v44, %v1127_v26  ;;  %v716_v46 = vpop.f32.mrb[23].mxu1  ;;  %1379 = vmatmul.mubr.bf16.vlgmr.msra.gmra.mrb[32].mxu0 %v777_v38  ;;  %v766_v55 = vmax.f32 %v722_v41, 0.0 }
 0x406   :  { %v717_v54 = vadd.f32 %v1127_v26, %v716_v46  ;;  %v764_v58 = vmax.f32 %v714_v43, 0.0 }
 0x407   :  { %v767_v57 = vmax.f32 %v725_v45, 0.0 }
 0x408   :  { %v765_v59 = vmax.f32 %v717_v54, 0.0 }
 0x409   :  { %v779_v60 = vpack.c.bf16 %v767_v57, %v766_v55  ;;  %v1137_v57 = vld [vmem:[%s1717_s3 + $0x2] ss:$0 sm:$0xff]  ;;  %s1573_s3 = smov [#allocation8]  }
 0x40a   :  { %v778_v61 = vpack.c.bf16 %v765_v59, %v764_v58  ;;  %v1356_v56 = vpop.f32.mrb[24].mxu1  ;;  %s1080_s30 = sshll.u32 %s1573_s3, 4  ;;  %s1081_s30 = int_to_ptr.vmem [resolvable:$true] %s1080_s30 }
 0x40b   :  { %v738_v62 = vadd.f32 %v1356_v56, %v1127_v26  ;;  %v729_v63 = vpop.f32.mrb[25].mxu1  ;;  %s1540_s5 = scalar_lea.vmem %s1081_s30, 2048  ;;  %p1545_p11 = scmp.lt.s32.totalorder %s1081_s30, %s1081_s30 }
 0x40c   :  { %v730_v0 = vadd.f32 %v1127_v26, %v729_v63  ;;  %v1357_v1 = vpop.f32.mrb[26].mxu1  ;;  %1382 = vmatprep.mubr.bf16.mxu0 %v778_v61  ;;  %p1541_p10 = scmp.ne.s32.totalorder %s1081_s30, %s1540_s5  ;;  %p1546_p12 = scmp.lt.s32.totalorder %s1540_s5, %s1540_s5 }
 0x40d   :  { %v741_v2 = vadd.f32 %v1357_v1, %v1127_v26  ;;  %v732_v3 = vpop.f32.mrb[27].mxu1  ;;  %1383 = vmatmul.mubr.bf16.gmra.mrb[36].mxu0 %v779_v60  ;;  %v770_v5 = vmax.f32 %v738_v62, 0.0 }
 0x40e   :  { %v733_v4 = vadd.f32 %v1127_v26, %v732_v3  ;;  %v768_v7 = vmax.f32 %v730_v0, 0.0  ;;  %p1547_p13 = por %p1546_p12, %p1545_p11 }
 0x40f   :  { %v771_v6 = vmax.f32 %v741_v2, 0.0 }
 0x410   :  { %v769_v8 = vmax.f32 %v733_v4, 0.0  ;;  %p1548_p0 = pnand %p1547_p13, %p1541_p10 }
 0x411   :  { %v781_v9 = vpack.c.bf16 %v771_v6, %v770_v5 }
 0x412   :  { %v780_v10 = vpack.c.bf16 %v769_v8, %v768_v7  ;;  %v1360_v11 = vpop.f32.mrb[28].mxu1 }
 0x413   :  { %v754_v12 = vadd.f32 %v1360_v11, %v1127_v26  ;;  %v745_v13 = vpop.f32.mrb[29].mxu1 }
 0x414   :  { %v746_v14 = vadd.f32 %v1127_v26, %v745_v13  ;;  %v1361_v15 = vpop.f32.mrb[30].mxu1  ;;  %1386 = vmatprep.mubr.bf16.mxu0 %v780_v10 }
 0x415   :  { %v757_v17 = vadd.f32 %v1361_v15, %v1127_v26  ;;  %v748_v18 = vpop.f32.mrb[31].mxu1  ;;  %1387 = vmatmul.mubr.bf16.gmra.mrb[40].mxu0 %v781_v9  ;;  %v774_v20 = vmax.f32 %v754_v12, 0.0 }
 0x416   :  { %v749_v19 = vadd.f32 %v1127_v26, %v748_v18  ;;  %v772_v22 = vmax.f32 %v746_v14, 0.0 }
 0x417   :  { %v775_v21 = vmax.f32 %v757_v17, 0.0 }
 0x418   :  { %v773_v23 = vmax.f32 %v749_v19, 0.0 }
 0x419   :  { %v783_v24 = vpack.c.bf16 %v775_v21, %v774_v20 }
 0x41a   :  { %v782_v25 = vpack.c.bf16 %v773_v23, %v772_v22 }
 0x41c   :  { %1390 = vmatprep.mubr.bf16.mxu0 %v782_v25 }
 0x41d   :  { %1391 = vmatmul.mubr.bf16.gmra.mrb[44].mxu0 %v783_v24 }
 0x4d8   :  { %v1380_v27 = vpop.f32.mrb[32].mxu0 }
 0x4d9   :  { %v883_v28 = vpop.f32.mrb[33].mxu0 }
 0x4da   :  { %v1381_v29 = vpop.f32.mrb[34].mxu0 }
 0x4db   :  { %v947_v30 = vpack.c.bf16 %v1381_v29, %v1380_v27  ;;  %v886_v31 = vpop.f32.mrb[35].mxu0 }
 0x4dc   :  { %v946_v32 = vpack.c.bf16 %v886_v31, %v883_v28 }
 0x4de   :  { %1394 = vmatprep.subr.bf16.mxu1 %v946_v32 }
 0x4df   :  { %1395 = vmatpush3.bf16.msra.mxu1 %v946_v32 }
 0x4e0   :  { %v1384_v33 = vpop.f32.mrb[36].mxu0  ;;  %1396 = vmatprep.subr.bf16.mxu1 %v947_v30 }
 0x4e1   :  { %v899_v34 = vpop.f32.mrb[37].mxu0 }
 0x4e2   :  { %v1385_v26 = vpop.f32.mrb[38].mxu0 }
 0x4e3   :  { %v949_v35 = vpack.c.bf16 %v1385_v26, %v1384_v33  ;;  %v902_v16 = vpop.f32.mrb[39].mxu0  ;;  %1397 = vmatpush3.bf16.msra.mxu1 %v947_v30 }
 0x4e4   :  { %v948_v36 = vpack.c.bf16 %v902_v16, %v899_v34 }
 0x4e6   :  { %1398 = vmatprep.subr.bf16.mxu1 %v948_v36 }
 0x4e7   :  { %1399 = vmatpush3.bf16.msra.mxu1 %v948_v36 }
 0x4e8   :  { %v1388_v37 = vpop.f32.mrb[40].mxu0  ;;  %1400 = vmatprep.subr.bf16.mxu1 %v949_v35 }
 0x4e9   :  { %v915_v38 = vpop.f32.mrb[41].mxu0 }
 0x4ea   :  { %v1389_v39 = vpop.f32.mrb[42].mxu0 }
 0x4eb   :  { %v951_v40 = vpack.c.bf16 %v1389_v39, %v1388_v37  ;;  %v918_v41 = vpop.f32.mrb[43].mxu0  ;;  %1401 = vmatpush3.bf16.msra.mxu1 %v949_v35 }
 0x4ec   :  { %v950_v42 = vpack.c.bf16 %v918_v41, %v915_v38 }
 0x4ee   :  { %1402 = vmatprep.subr.bf16.mxu1 %v950_v42 }
 0x4ef   :  { %1403 = vmatpush3.bf16.msra.mxu1 %v950_v42 }
 0x4f0   :  { %v1392_v43 = vpop.f32.mrb[44].mxu0  ;;  %1404 = vmatprep.subr.bf16.mxu1 %v951_v40 }
 0x4f1   :  { %v931_v44 = vpop.f32.mrb[45].mxu0 }
 0x4f2   :  { %v1393_v45 = vpop.f32.mrb[46].mxu0 }
 0x4f3   :  { %v953_v46 = vpack.c.bf16 %v1393_v45, %v1392_v43  ;;  %v934_v54 = vpop.f32.mrb[47].mxu0  ;;  %1405 = vmatpush3.bf16.msra.mxu1 %v951_v40 }
 0x4f4   :  { %v952_v55 = vpack.c.bf16 %v934_v54, %v931_v44 }
 0x4f6   :  { %1406 = vmatprep.subr.bf16.mxu1 %v952_v55 }
 0x4f7   :  { %1407 = vmatpush3.bf16.msra.mxu1 %v952_v55 }
 0x4f8   :  { %1408 = vmatprep.subr.bf16.mxu1 %v953_v46 }
 0x4fb   :  { %1409 = vmatpush3.bf16.msra.mxu1 %v953_v46 }
 0x4fe   :  { %1411 = vmatmul.mubr.bf16.vlgmr.msra.gmra.mrb[32].mxu1 %v1656_v47 }
 0x4ff   :  { %1414 = vmatprep.mubr.bf16.mxu1 %v1658_v48 }
 0x506   :  { %1415 = vmatmul.mubr.bf16.gmra.mrb[36].mxu1 %v1662_v49 }
 0x507   :  { %1418 = vmatprep.mubr.bf16.mxu1 %v1664_v50 }
 0x50e   :  { %1419 = vmatmul.mubr.bf16.gmra.mrb[40].mxu1 %v1668_v51 }
 0x50f   :  { %1422 = vmatprep.mubr.bf16.mxu1 %v1670_v52 }
 0x516   :  { %1423 = vmatmul.mubr.bf16.gmra.mrb[44].mxu1 %v1674_v53 }
 0x5d1   :  { %v1412_v58 = vpop.f32.mrb[32].mxu1 }
 0x5d2   :  { %v1005_v59 = vadd.f32 %v1412_v58, %v1137_v57  ;;  %v996_v60 = vpop.f32.mrb[33].mxu1 }
 0x5d3   :  { %v997_v47 = vadd.f32 %v1137_v57, %v996_v60  ;;  %v1413_v61 = vpop.f32.mrb[34].mxu1 }
 0x5d4   :  { %1061 = vst [vmem:[#allocation8 + $0x10] sm:$0xff] %v1005_v59  ;;  %v1008_v48 = vadd.f32 %v1413_v61, %v1137_v57  ;;  %v999_v49 = vpop.f32.mrb[35].mxu1 }
 0x5d5   :  { %1059 = vst [vmem:[#allocation8] sm:$0xff] %v997_v47  ;;  %v1000_v50 = vadd.f32 %v1137_v57, %v999_v49 }
 0x5d6   :  { %1062 = vst [vmem:[#allocation8 + $0x18] sm:$0xff] %v1008_v48 }
 0x5d7   :  { %1060 = vst [vmem:[#allocation8 + $0x8] sm:$0xff] %v1000_v50 }
 0x5d9   :  { %v1416_v51 = vpop.f32.mrb[36].mxu1 }
 0x5da   :  { %v1021_v52 = vadd.f32 %v1416_v51, %v1137_v57  ;;  %v1012_v56 = vpop.f32.mrb[37].mxu1 }
 0x5db   :  { %v1013_v53 = vadd.f32 %v1137_v57, %v1012_v56  ;;  %v1417_v62 = vpop.f32.mrb[38].mxu1 }
 0x5dc   :  { %1065 = vst [vmem:[#allocation8 + $0x30] sm:$0xff] %v1021_v52  ;;  %v1024_v63 = vadd.f32 %v1417_v62, %v1137_v57  ;;  %v1015_v0 = vpop.f32.mrb[39].mxu1 }
 0x5dd   :  { %1063 = vst [vmem:[#allocation8 + $0x20] sm:$0xff] %v1013_v53  ;;  %v1016_v1 = vadd.f32 %v1137_v57, %v1015_v0 }
 0x5de   :  { %1066 = vst [vmem:[#allocation8 + $0x38] sm:$0xff] %v1024_v63 }
 0x5df   :  { %1064 = vst [vmem:[#allocation8 + $0x28] sm:$0xff] %v1016_v1 }
 0x5e1   :  { %v1420_v2 = vpop.f32.mrb[40].mxu1 }
 0x5e2   :  { %v1037_v3 = vadd.f32 %v1420_v2, %v1137_v57  ;;  %v1028_v4 = vpop.f32.mrb[41].mxu1 }
 0x5e3   :  { %v1029_v5 = vadd.f32 %v1137_v57, %v1028_v4  ;;  %v1421_v6 = vpop.f32.mrb[42].mxu1 }
 0x5e4   :  { %1069 = vst [vmem:[#allocation8 + $0x50] sm:$0xff] %v1037_v3  ;;  %v1040_v7 = vadd.f32 %v1421_v6, %v1137_v57  ;;  %v1031_v8 = vpop.f32.mrb[43].mxu1 }
 0x5e5   :  { %1067 = vst [vmem:[#allocation8 + $0x40] sm:$0xff] %v1029_v5  ;;  %v1032_v9 = vadd.f32 %v1137_v57, %v1031_v8 }
 0x5e6   :  { %1070 = vst [vmem:[#allocation8 + $0x58] sm:$0xff] %v1040_v7 }
 0x5e7   :  { %1068 = vst [vmem:[#allocation8 + $0x48] sm:$0xff] %v1032_v9 }
 0x5e9   :  { %v1424_v10 = vpop.f32.mrb[44].mxu1 }
 0x5ea   :  { %v1053_v11 = vadd.f32 %v1424_v10, %v1137_v57  ;;  %v1044_v12 = vpop.f32.mrb[45].mxu1 }
 0x5eb   :  { %v1045_v13 = vadd.f32 %v1137_v57, %v1044_v12  ;;  %v1425_v14 = vpop.f32.mrb[46].mxu1 }
 0x5ec   :  { %1073 = vst [vmem:[#allocation8 + $0x70] sm:$0xff] %v1053_v11  ;;  %v1056_v15 = vadd.f32 %v1425_v14, %v1137_v57  ;;  %v1047_v17 = vpop.f32.mrb[47].mxu1 }
 0x5ed   :  { %1071 = vst [vmem:[#allocation8 + $0x60] sm:$0xff] %v1045_v13  ;;  %v1048_v18 = vadd.f32 %v1137_v57, %v1047_v17 }
 0x5ee   :  { %1074 = vst [vmem:[#allocation8 + $0x78] sm:$0xff] %v1056_v15 }
 0x5ef   :  { %1072 = vst [vmem:[#allocation8 + $0x68] sm:$0xff] %v1048_v18 }
 0x5f0   :  { %1551 = shalt.err (!%p1548_p0)
}
 0x5f1   :  { %s1552_s8 = scalar_lea.hbm %s1718_s4, 2048 }
 0x5f2   :  { %p1553_p1 = scmp.ne.s32.totalorder %s1718_s4, %s1552_s8  ;;  %p1556_p2 = scmp.lt.u32.totalorder %s1552_s8, %s1718_s4 }
 0x5f4   :  { %p1558_p3 = pnand %p1556_p2, %p1553_p1 }
 0x5f6   :  { %1561 = shalt.err (!%p1558_p3)
}
 0x5f7   :  { %s1574_s1 = smov 128   ;;  %s1575_s13 = smov 8  }
 0x5f8   :  { %1086 = dma.vmem_to_hbm [thread:$0]  %s1081_s30, 2048, %s1718_s4, [#allocation4], %s1574_s1, %s1574_s1, %s1575_s13  }
 0x5f9   :  { %1566 = dma.done.wait [#allocation4], 2048  }
 0x5fa   :  { %1567 = vsyncadd [#allocation4], 4294965248 }
 0x5fb   :  { %1090 = vsyncpa [#allocation3], 1 }
 0x5fc   :  { %1091 = vsyncpa [#allocation6], 1 }
 0x5fd   :  { %1092 = vsyncpa [#allocation4], 1 }

</bundles_post_ra>
